<compile_context>
chip_gen: v7x
topology: tpu7x:2x2x1
jax: 0.10.0
libtpu: 0.0.40
codegen_flags: <defaults>
</compile_context>

<pallas_src>
import functools

import jax
import jax.numpy as jnp
from jax.experimental import pallas as pl
from jax.experimental.pallas import tpu as pltpu


def _round_up(x, m):
    return ((x + m - 1) // m) * m


# ----------------------------------------------------------------------------
# Fused kernel body.  Grid = (num_total_layers, num_row_tiles), both
# "arbitrary" (layer outer, row tiles inner).
#   refs = (x_full, a_rowtile, w_layer, b_layer, out_block, h_scratch)
# ----------------------------------------------------------------------------
def _gcn_ens_kernel(x_ref, a_ref, w_ref, b_ref, out_ref, h_scratch, *, tm):
    l = pl.program_id(0)   # GraphConv layer index
    i = pl.program_id(1)   # row-tile index

    # One-time init: layer-0 activations are the (padded, bf16) node features.
    @pl.when(jnp.logical_and(l == 0, i == 0))
    def _():
        h_scratch[0] = x_ref[...]

    src = jax.lax.rem(l, 2)          # slot holding this layer's input activations

    # Aggregate-first: (A @ H) @ W.  Under row tiling this is always the right
    # order (transform-first would recompute H @ W once per row tile).
    a = a_ref[...]                                   # (tm, N_pad)   bf16
    h = h_scratch[src]                               # (N_pad, FEAT) bf16
    ah = jnp.dot(a, h, preferred_element_type=jnp.float32)          # f32 acc
    pre = jnp.dot(ah.astype(jnp.bfloat16), w_ref[0],
                  preferred_element_type=jnp.float32) + b_ref[0]    # (tm, FEAT) f32

    # Pre-activation features / logits go to HBM in f32 (lane-dense, FEAT=128k).
    out_ref[0] = pre.astype(out_ref.dtype)

    # ReLU only feeds the next layer (never stored to HBM).  Writing on the
    # final classifier layer is harmless; nothing reads it.
    # TODO(synk): dropout is identity here (module default p=0 / eval mode).
    relu_h = jnp.maximum(pre, 0.0).astype(h_scratch.dtype)
    start = pl.multiple_of(i * tm, tm)

    @pl.when(src == 0)
    def _():
        h_scratch[1, pl.ds(start, tm), :] = relu_h

    @pl.when(src == 1)
    def _():
        h_scratch[0, pl.ds(start, tm), :] = relu_h


# ----------------------------------------------------------------------------
# One-time parameter packing (hoisted out of the per-call path).
# ----------------------------------------------------------------------------
def prepare_gcn_ens_params(branch_params):
    """branch_params: list (num_branches) of lists of (W, b), len=num_layers+1.

    Returns (w_all, b_all, meta) with w_all: [L, FEAT, FEAT] bf16 (zero-padded,
    layer 0 branch-concatenated, layers>=1 block-diagonal) and b_all:
    [L, 1, FEAT] f32.
    """
    num_branches = len(branch_params)
    n_w = len(branch_params[0])              # hidden layers + classifier
    num_layers = n_w - 1
    in_dim = branch_params[0][0][0].shape[0]
    hidden = branch_params[0][0][0].shape[1]
    num_classes = branch_params[0][-1][0].shape[1]

    feat = _round_up(max(in_dim, num_branches * hidden,
                         num_branches * num_classes), 128)

    ws, bs = [], []
    # Layer 0: all branches share the input features -> concat on the out dim.
    ws.append(jnp.concatenate([p[0][0] for p in branch_params], axis=1))
    bs.append(jnp.concatenate([p[0][1] for p in branch_params], axis=0))
    # Layers >= 1: activations are branch-stacked on lanes -> block-diagonal W.
    for l in range(1, n_w):
        ws.append(jax.scipy.linalg.block_diag(
            *[p[l][0] for p in branch_params]))
        bs.append(jnp.concatenate([p[l][1] for p in branch_params], axis=0))

    w_all = jnp.zeros((n_w, feat, feat), jnp.float32)
    b_all = jnp.zeros((n_w, 1, feat), jnp.float32)
    for l in range(n_w):
        fi, fo = ws[l].shape
        w_all = w_all.at[l, :fi, :fo].set(ws[l].astype(jnp.float32))
        b_all = b_all.at[l, 0, :fo].set(bs[l].astype(jnp.float32))

    meta = dict(num_branches=num_branches, num_layers=num_layers,
                in_dim=in_dim, hidden=hidden, num_classes=num_classes,
                feat=feat)
    return w_all.astype(jnp.bfloat16), b_all, meta


# ----------------------------------------------------------------------------
# Forward: pad/cast A and X, run the single fused pallas_call, unpack results
# to match the PyTorch (output, featss) API.
# ----------------------------------------------------------------------------
def gcn_ens_forward(a_norm, x, w_all, b_all, meta):
    num_branches = meta["num_branches"]
    num_layers = meta["num_layers"]
    hidden = meta["hidden"]
    num_classes = meta["num_classes"]
    feat = meta["feat"]
    n_w = num_layers + 1
    n, in_dim = x.shape

    # Row tiling: large tiles pipeline the A_norm DMA against the MXU; tiny
    # graphs use a single tile covering the whole graph.
    tm = 512 if n >= 512 else _round_up(n, 8)
    n_pad = _round_up(n, tm)
    num_row_tiles = n_pad // tm

    # Pad + cast once: bf16 MXU inputs (A dominates HBM traffic), zeros in the
    # padded rows/cols so they never contaminate real rows.
    a_pad = jnp.zeros((n_pad, n_pad), jnp.bfloat16).at[:n, :n].set(
        a_norm.astype(jnp.bfloat16))
    x_pad = jnp.zeros((n_pad, feat), jnp.bfloat16).at[:n, :in_dim].set(
        x.astype(jnp.bfloat16))

    kernel = functools.partial(_gcn_ens_kernel, tm=tm)

    flops = n_w * (2 * n_pad * n_pad * feat + 2 * n_pad * feat * feat)
    bytes_accessed = (n_w * n_pad * n_pad * 2      # A re-read per layer (bf16)
                      + n_pad * feat * 2           # X (bf16)
                      + n_w * feat * feat * 2      # W (bf16)
                      + n_w * feat * 4             # b (f32)
                      + n_w * n_pad * feat * 4)    # outputs (f32)

    out = pl.pallas_call(
        kernel,
        out_shape=jax.ShapeDtypeStruct((n_w, n_pad, feat), jnp.float32),
        grid=(n_w, num_row_tiles),
        in_specs=[
            pl.BlockSpec((n_pad, feat), lambda l, i: (0, 0)),       # X resident
            pl.BlockSpec((tm, n_pad), lambda l, i: (i, 0)),         # A row tile
            pl.BlockSpec((1, feat, feat), lambda l, i: (l, 0, 0)),  # W[layer]
            pl.BlockSpec((1, 1, feat), lambda l, i: (l, 0, 0)),     # b[layer]
        ],
        out_specs=pl.BlockSpec((1, tm, feat), lambda l, i: (l, i, 0)),
        scratch_shapes=[pltpu.VMEM((2, n_pad, feat), jnp.bfloat16)],
        compiler_params=pltpu.CompilerParams(
            # Both axes "arbitrary": the persistent H scratch couples row tiles
            # across layers (see TODO at top for v7x megacore).
            dimension_semantics=("arbitrary", "arbitrary"),
            vmem_limit_bytes=64 * 1024 * 1024,
        ),
        cost_estimate=pl.CostEstimate(
            flops=int(flops), transcendentals=0,
            bytes_accessed=int(bytes_accessed)),
    )(x_pad, a_pad, w_all, b_all)

    # Unpack lane-stacked slabs back to per-branch tensors (layout plumbing).
    logits = out[num_layers]
    output = jnp.stack(
        [logits[:n, b * num_classes:(b + 1) * num_classes]
         for b in range(num_branches)],
        axis=0)                                     # [B, N, num_classes]
    featss = [
        [out[l, :n, b * hidden:(b + 1) * hidden] for l in range(num_layers)]
        for b in range(num_branches)
    ]
    return output, featss


# ----------------------------------------------------------------------------
# Deterministic parameter / graph construction
# ----------------------------------------------------------------------------
def init_gcn_params(key, num_layers, in_dim, hidden_dim, num_classes):
    """Xavier-uniform weights, zero bias (DGL GraphConv defaults)."""
    dims = [in_dim] + [hidden_dim] * num_layers + [num_classes]
    params = []
    for l in range(num_layers + 1):
        key, sub = jax.random.split(key)
        f_in, f_out = dims[l], dims[l + 1]
        limit = (6.0 / (f_in + f_out)) ** 0.5
        w = jax.random.uniform(sub, (f_in, f_out), jnp.float32, -limit, limit)
        b = jnp.zeros((f_out,), jnp.float32)
        params.append((w, b))
    return key, params


def build_normalized_adjacency(key, n):
    """Random symmetric graph with self-loops, norm='both': D^-1/2 A D^-1/2."""
    key, sub = jax.random.split(key)
    a = (jax.random.uniform(sub, (n, n)) < 0.3).astype(jnp.float32)
    a = jnp.maximum(a, a.T)                 # symmetrize
    a = jnp.maximum(a, jnp.eye(n))          # self-loops (avoids zero degree)
    deg = jnp.sum(a, axis=1)
    d_inv_sqrt = 1.0 / jnp.sqrt(deg)
    a_norm = a * d_inv_sqrt[:, None] * d_inv_sqrt[None, :]
    return key, a_norm


if __name__ == "__main__":
    # Small shapes consistent with the module's forward.
    num_layers = 2
    in_dim = 8
    hidden_dim = 32
    num_classes = 4
    num_branches = 2
    n_nodes = 16

    key = jax.random.PRNGKey(0)
    key, a_norm = build_normalized_adjacency(key, n_nodes)

    key, sub = jax.random.split(key)
    x = jax.random.normal(sub, (n_nodes, in_dim), jnp.float32)

    branch_params = []
    for _ in range(num_branches):
        key, params = init_gcn_params(key, num_layers, in_dim,
                                      hidden_dim, num_classes)
        branch_params.append(params)

    # One-time parameter packing (outside the per-call path).
    w_all, b_all, meta = prepare_gcn_ens_params(branch_params)

    output, featss = gcn_ens_forward(a_norm, x, w_all, b_all, meta)
    output = jax.block_until_ready(output)
    for feats in featss:
        for f in feats:
            jax.block_until_ready(f)

    assert output.shape == (num_branches, n_nodes, num_classes)
    assert len(featss) == num_branches and len(featss[0]) == num_layers
    assert featss[0][0].shape == (n_nodes, hidden_dim)
    assert bool(jnp.all(jnp.isfinite(output)))
    print("KERNEL_OK")
</pallas_src>

<mosaic_0001>
module attributes {stable_mosaic.version = 11 : i64} {
  func.func @_gcn_ens_kernel(%arg0: i32, %arg1: i32, %arg2: memref<16x128xbf16, #tpu.memory_space<vmem>>, %arg3: memref<16x16xbf16, #tpu.memory_space<vmem>>, %arg4: memref<1x128x128xbf16, #tpu.memory_space<vmem>>, %arg5: memref<1x1x128xf32, #tpu.memory_space<vmem>>, %arg6: memref<1x16x128xf32, #tpu.memory_space<vmem>>, %arg7: memref<2x16x128xbf16, #tpu.memory_space<vmem>>) attributes {dimension_semantics = [#tpu.dimension_semantics<arbitrary>, #tpu.dimension_semantics<arbitrary>], iteration_bounds = array<i64: 3, 1>, scalar_prefetch = 0 : i64, scratch_operands = 1 : i64, tpu.core_type = #tpu.core_type<tc>, window_params = [{pipeline_mode = #tpu.pipeline_mode<synchronous>, transform_indices = @transform_0, window_bounds = array<i64: 16, 128>}, {transform_indices = @transform_1, window_bounds = array<i64: 16, 16>}, {transform_indices = @transform_2, window_bounds = array<i64: 1, 128, 128>}, {transform_indices = @transform_3, window_bounds = array<i64: 1, 1, 128>}, {transform_indices = @transform_4, window_bounds = array<i64: 1, 16, 128>}]} {
    %c0_i32 = arith.constant 0 : i32
    %0 = arith.cmpi eq, %arg0, %c0_i32 : i32
    %c0_i32_0 = arith.constant 0 : i32
    %1 = arith.cmpi eq, %arg1, %c0_i32_0 : i32
    %2 = arith.andi %0, %1 : i1
    %3 = arith.extui %2 : i1 to i32
    %c0_i32_1 = arith.constant 0 : i32
    %4 = arith.cmpi ne, %3, %c0_i32_1 : i32
    scf.if %4 {
      %c0_19 = arith.constant 0 : index
      %c0_20 = arith.constant 0 : index
      %33 = vector.load %arg2[%c0_19, %c0_20] : memref<16x128xbf16, #tpu.memory_space<vmem>>, vector<16x128xbf16>
      %c0_21 = arith.constant 0 : index
      %c0_22 = arith.constant 0 : index
      %c0_23 = arith.constant 0 : index
      %34 = vector.load %arg7[%c0_21, %c0_22, %c0_23] : memref<2x16x128xbf16, #tpu.memory_space<vmem>>, vector<1x16x128xbf16>
      %35 = vector.shape_cast %34 : vector<1x16x128xbf16> to vector<16x128xbf16>
      %36 = vector.shape_cast %33 : vector<16x128xbf16> to vector<1x16x128xbf16>
      tpu.vector_store %arg7[%c0_21, %c0_22, %c0_23], %36 {strides = array<i32>} : memref<2x16x128xbf16, #tpu.memory_space<vmem>>, vector<1x16x128xbf16>,
    } else {
    }
    %c2_i32 = arith.constant 2 : i32
    %5 = arith.remsi %arg0, %c2_i32 : i32
    %c0 = arith.constant 0 : index
    %c0_2 = arith.constant 0 : index
    %6 = vector.load %arg3[%c0, %c0_2] : memref<16x16xbf16, #tpu.memory_space<vmem>>, vector<16x16xbf16>
    %7 = arith.index_cast %5 : i32 to index
    %c0_3 = arith.constant 0 : index
    %c0_4 = arith.constant 0 : index
    %8 = vector.load %arg7[%7, %c0_3, %c0_4] : memref<2x16x128xbf16, #tpu.memory_space<vmem>>, vector<1x16x128xbf16>
    %9 = vector.shape_cast %8 : vector<1x16x128xbf16> to vector<16x128xbf16>
    %cst = arith.constant dense<0.000000e+00> : vector<16x128xf32>
    %10 = tpu.matmul %6, %9, %cst {dimension_numbers = #tpu.dot_dimension_numbers<[1], [0], [0], [1], [0, 0, 1, 1], [], []>} : vector<16x16xbf16>, vector<16x128xbf16>, vector<16x128xf32> -> vector<16x128xf32>
    %11 = arith.truncf %10 : vector<16x128xf32> to vector<16x128xbf16>
    %c0_5 = arith.constant 0 : index
    %c0_6 = arith.constant 0 : index
    %c0_7 = arith.constant 0 : index
    %12 = vector.load %arg4[%c0_5, %c0_6, %c0_7] : memref<1x128x128xbf16, #tpu.memory_space<vmem>>, vector<1x128x128xbf16>
    %13 = vector.shape_cast %12 : vector<1x128x128xbf16> to vector<128x128xbf16>
    %cst_8 = arith.constant dense<0.000000e+00> : vector<16x128xf32>
    %14 = tpu.matmul %11, %13, %cst_8 {dimension_numbers = #tpu.dot_dimension_numbers<[1], [0], [0], [1], [0, 0, 1, 1], [], []>} : vector<16x128xbf16>, vector<128x128xbf16>, vector<16x128xf32> -> vector<16x128xf32>
    %c0_9 = arith.constant 0 : index
    %c0_10 = arith.constant 0 : index
    %c0_11 = arith.constant 0 : index
    %15 = vector.load %arg5[%c0_9, %c0_10, %c0_11] : memref<1x1x128xf32, #tpu.memory_space<vmem>>, vector<1x1x128xf32>
    %16 = vector.shape_cast %15 : vector<1x1x128xf32> to vector<1x128xf32>
    %17 = vector.broadcast %16 : vector<1x128xf32> to vector<16x128xf32>
    %18 = arith.addf %14, %17 : vector<16x128xf32>
    %c0_12 = arith.constant 0 : index
    %c0_13 = arith.constant 0 : index
    %c0_14 = arith.constant 0 : index
    %19 = vector.load %arg6[%c0_12, %c0_13, %c0_14] : memref<1x16x128xf32, #tpu.memory_space<vmem>>, vector<1x16x128xf32>
    %20 = vector.shape_cast %19 : vector<1x16x128xf32> to vector<16x128xf32>
    %21 = vector.shape_cast %18 : vector<16x128xf32> to vector<1x16x128xf32>
    tpu.vector_store %arg6[%c0_12, %c0_13, %c0_14], %21 {strides = array<i32>} : memref<1x16x128xf32, #tpu.memory_space<vmem>>, vector<1x16x128xf32>,
    %cst_15 = arith.constant 0.000000e+00 : f32
    %22 = vector.broadcast %cst_15 : f32 to vector<16x128xf32>
    %23 = arith.maximumf %18, %22 : vector<16x128xf32>
    %24 = arith.truncf %23 : vector<16x128xf32> to vector<16x128xbf16>
    %c16_i32 = arith.constant 16 : i32
    %25 = arith.muli %arg1, %c16_i32 : i32
    %26 = tpu.assume_multiple %25, 16 : i32
    %c0_i32_16 = arith.constant 0 : i32
    %27 = arith.cmpi eq, %5, %c0_i32_16 : i32
    %28 = arith.extui %27 : i1 to i32
    %c0_i32_17 = arith.constant 0 : i32
    %29 = arith.cmpi ne, %28, %c0_i32_17 : i32
    scf.if %29 {
      %c1 = arith.constant 1 : index
      %33 = arith.index_cast %26 : i32 to index
      %c0_19 = arith.constant 0 : index
      %34 = vector.load %arg7[%c1, %33, %c0_19] : memref<2x16x128xbf16, #tpu.memory_space<vmem>>, vector<1x16x128xbf16>
      %35 = vector.shape_cast %34 : vector<1x16x128xbf16> to vector<16x128xbf16>
      %36 = vector.shape_cast %24 : vector<16x128xbf16> to vector<1x16x128xbf16>
      tpu.vector_store %arg7[%c1, %33, %c0_19], %36 {strides = array<i32>} : memref<2x16x128xbf16, #tpu.memory_space<vmem>>, vector<1x16x128xbf16>,
    } else {
    }
    %c1_i32 = arith.constant 1 : i32
    %30 = arith.cmpi eq, %5, %c1_i32 : i32
    %31 = arith.extui %30 : i1 to i32
    %c0_i32_18 = arith.constant 0 : i32
    %32 = arith.cmpi ne, %31, %c0_i32_18 : i32
    scf.if %32 {
      %c0_19 = arith.constant 0 : index
      %33 = arith.index_cast %26 : i32 to index
      %c0_20 = arith.constant 0 : index
      %34 = vector.load %arg7[%c0_19, %33, %c0_20] : memref<2x16x128xbf16, #tpu.memory_space<vmem>>, vector<1x16x128xbf16>
      %35 = vector.shape_cast %34 : vector<1x16x128xbf16> to vector<16x128xbf16>
      %36 = vector.shape_cast %24 : vector<16x128xbf16> to vector<1x16x128xbf16>
      tpu.vector_store %arg7[%c0_19, %33, %c0_20], %36 {strides = array<i32>} : memref<2x16x128xbf16, #tpu.memory_space<vmem>>, vector<1x16x128xbf16>,
    } else {
    }
    return
  }
  func.func @transform_0(%arg0: i32, %arg1: i32) -> (i32, i32) {
    %c0_i32 = arith.constant 0 : i32
    %c0_i32_0 = arith.constant 0 : i32
    %c0_i32_1 = arith.constant 0 : i32
    return %c0_i32, %c0_i32_0 : i32, i32
  }
  func.func @transform_1(%arg0: i32, %arg1: i32) -> (i32, i32) {
    %c0_i32 = arith.constant 0 : i32
    %c0_i32_0 = arith.constant 0 : i32
    return %arg1, %c0_i32 : i32, i32
  }
  func.func @transform_2(%arg0: i32, %arg1: i32) -> (i32, i32, i32) {
    %c0_i32 = arith.constant 0 : i32
    %c0_i32_0 = arith.constant 0 : i32
    %c0_i32_1 = arith.constant 0 : i32
    return %arg0, %c0_i32, %c0_i32_0 : i32, i32, i32
  }
  func.func @transform_3(%arg0: i32, %arg1: i32) -> (i32, i32, i32) {
    %c0_i32 = arith.constant 0 : i32
    %c0_i32_0 = arith.constant 0 : i32
    %c0_i32_1 = arith.constant 0 : i32
    return %arg0, %c0_i32, %c0_i32_0 : i32, i32, i32
  }
  func.func @transform_4(%arg0: i32, %arg1: i32) -> (i32, i32, i32) {
    %c0_i32 = arith.constant 0 : i32
    %c0_i32_0 = arith.constant 0 : i32
    return %arg0, %arg1, %c0_i32 : i32, i32, i32
  }
}

</mosaic_0001>

<bundles_post_ra>
// kernel: tpu_custom_call.1
= control target key start
LH: loop header
LB: loop body
LE: loop exit
PB: predicated region body
PF: predicated region fallthrough
CT: control target
= control target key end

     0   :  { %s1408_s0 = inlined_call_operand.hbm [shape: bf16[16,128], index: 0, kind: input, shape index: {}]   ;;  %s1409_s1 = inlined_call_operand.hbm [shape: bf16[16,16], index: 1, kind: input, shape index: {}]   ;;  %s1410_s2 = inlined_call_operand.hbm [shape: bf16[3,128,128], index: 2, kind: input, shape index: {}]   ;;  %s1411_s3 = inlined_call_operand.hbm [shape: f32[3,1,128], index: 3, kind: input, shape index: {}]   ;;  %s1412_s4 = inlined_call_operand.hbm [shape: f32[3,16,128], index: 4, kind: output, shape index: {}]  }
   0x1   :  { %1425 = sst [smem:[#allocation17_spill]] %s1408_s0 }
   0x2   :  { %1426 = sst [smem:[#allocation18_spill]] %s1410_s2 }
   0x3   :  { %1427 = sst [smem:[#allocation19_spill]] %s1412_s4 }
   0x4   :  { %9 = vsyncpa [#allocation4], 0 }
   0x5   :  { %10 = vsyncpa [#allocation7], 0 }
   0x6   :  { %11 = vsyncpa [#allocation5], 0 }
   0x7   :  { %13 = vsyncpa [#allocation5 + $0x1], 0  ;;  %s1084_s15 = smov 0   ;;  %s1086_s16 = smov 0  }
   0x8   :  { %s1088_s17 = smov 0   ;;  %s1090_s18 = smov 0  }
   0x9   :  { %s1092_s19 = smov 0   ;;  %s1094_s20 = smov 0  }
   0xa LB: > { %1428 = sst [smem:[#allocation15_spill]] %s1026_s15  ;;  %s1115_s21 = sadd.s32 4294967295, %s1046_s20   ;;  %s1046_s20 = sphi %s1094_s20, %s19_s20   ;;  %s1042_s19 = sphi %s1092_s19, %s1462_s19   ;;  %s1038_s18 = sphi %s1090_s18, %s1461_s18   ;;  %s1034_s17 = sphi %s1088_s17, %s1460_s17   ;;  %s1030_s16 = sphi %s1086_s16, %s1459_s16   ;;  %s1026_s15 = sphi %s1084_s15, %s1458_s15  }
   0xb   : > { %s659_s22 = sadd.s32 4294967294, %s1046_s20   ;;  %p92_p0 = scmp.ne.s32.totalorder %s1034_s17, %s1030_s16 }
   0xc   : > { %p93_p1 = scmp.eq.s32.totalorder %s1046_s20, 0  ;;  %p98_p2 = scmp.ne.s32.totalorder %s1030_s16, %s1026_s15 }
   0xd   : > { %p1413_p3 = scmp.eq.s32.totalorder %s1115_s21, 0  ;;  %p150_p4 = scmp.eq.s32.totalorder %s1115_s21, 2 }
   0xe   : > { %p1126_p5 = por %p93_p1, %p92_p0  ;;  %p156_p6 = scmp.eq.s32.totalorder %s659_s22, 2 }
   0xf   : > { %p1132_p7 = por %p1413_p3, %p98_p2  ;;  %p1136_p8 = por %p150_p4, %p92_p0 }
  0x10   : > { %p1140_p9 = por %p156_p6, %p98_p2  ;;  %p660_p10 = scmp.ge.s32.totalorder %s1046_s20, 1 }
  0x11   : > { %s1430_s25 = scalar_select %p1132_p7, 1, 0 }
  0x12   : > { %s1431_s26 = scalar_select %p1136_p8, 1, 0 }
  0x13   : > { %s1432_s27 = scalar_select %p1140_p9, 1, 0 }
  0x14   : > { %p163_p11 = scmp.lt.s32.totalorder %s1046_s20, 4  ;;  %s1048_s29 = smov [#allocation3]  }
  0x15   : > { %1433 = sst [smem:[#allocation16_spill]] %s1432_s27  ;;  %s175_s30 = sshll.u32 %s1048_s29, 4  ;;  %s1150_s30 = int_to_ptr.vmem [resolvable:$true] %s175_s30 }
  0x16   : > { %p1146_p12 = pnand %p660_p10, %p163_p11  ;;  %p770_p0 = scmp.lt.s32.totalorder %s1046_s20, 3 }
  0x17   : > { %s31_s7 = sadd.s32 1, %s1042_s19  ;;  %s1438_s0 = sld [smem:[#allocation17_spill]] }
  0x18   : > { %s1434_s28 = scalar_select %p1146_p12, 1, 0 }
  0x19   : > { %p750_p13 = pneg %p1146_p12  ;;  %p1163_p2 = pnand %p770_p0, %p1126_p5 }
  0x1a   : > { %p1168_p4 = scmp.ge.s32.totalorder %s31_s7, 3 }
  0x1b   : > { %p1157_p1 = pnand %p750_p13, %p1413_p3 }
  0x1c   : > { %s1436_s6 = scalar_select %p1163_p2, 1, 0 }
  0x1d   : > { %s840_s11 = scalar_lea.hbm %s1438_s0, 128  ;;  %p1420_p10 = pneg %p1157_p1 }
  0x1e   : > { %p841_p6 = scmp.ne.s32.totalorder %s1438_s0, %s840_s11  ;;  %p847_p13 = scmp.lt.u32.totalorder %s840_s11, %s1438_s0 }
  0x20   : > { %p843_p5 = pnand %p1420_p10, %p841_p6 }
  0x22   : > { %p844_p11 = pneg %p843_p5 }
  0x24   : > { %p849_p0 = pnand %p847_p13, %p844_p11 }
  0x26   : > { %852 = shalt.err (!%p849_p0)
}
  0x27   : > { %s853_s24 = scalar_lea.vmem %s1150_s30, 128  ;;  %p861_p7 = scmp.lt.s32.totalorder %s1150_s30, %s1150_s30 }
  0x28   : > { %p854_p3 = scmp.ne.s32.totalorder %s1150_s30, %s853_s24  ;;  %p862_p6 = scmp.lt.s32.totalorder %s853_s24, %s853_s24 }
  0x2a   : > { %p856_p9 = pnand %p854_p3, %p1420_p10  ;;  %p863_p5 = por %p862_p6, %p861_p7 }
  0x2c   : > { %p857_p8 = pneg %p856_p9 }
  0x2e   : > { %p864_p12 = pnand %p863_p5, %p857_p8 }
  0x30   : > { %867 = shalt.err (!%p864_p12)
}
  0x31   : > { %s1049_s29 = smov 64   ;;  %s1050_s9 = smov 4  }
  0x32   : > { %753 = dma.hbm_to_vmem [thread:$0]  (!%p1157_p1), %s1438_s0, 128, %s1150_s30, [#allocation4], %s1049_s29, %s1049_s29, %s1050_s9  }
  0x33   : > { %s205_s12 = sand.u32 1, %s1046_s20   ;;  %s1464_s7 = smov (%p1168_p4, %s31_s7), 0 }
  0x34   : > { %s1421_s13 = sand.u32 1, %s1034_s17   ;;  %s82_s14 = ssub.s32 %s1042_s19, %s1464_s7 }
  0x35   : > { %s664_s22 = sshll.u32 %s1421_s13, 6  ;;  %p83_p3 = scmp.eq.s32.totalorder %s82_s14, 0 }
  0x36   : > { %s696_s24 = sshll.u32 %s1042_s19, 10  ;;  %s209_s23 = scalar_lea.vmem [#allocation8], %s664_s22 }
  0x37   : > { %s216_s27 = sshll.u32 %s209_s23, 4  ;;  %s1439_s15 = sadd.s32 1, %s1034_s17  ;;  %s1223_s27 = int_to_ptr.vmem [resolvable:$true] %s216_s27 }
  0x38   : > { %s1216_s4 = scalar_select %p83_p3, %s1034_s17, %s1439_s15  }
  0x39   : > { %s1440_s2 = sld [smem:[#allocation18_spill]]  ;;  %s1225_s8 = scalar_lea.sflag [#allocation4], %s205_s12 }
  0x3a   : > { %p1422_p8 = pneg %p1163_p2 }
  0x3f   : > { %s1221_s11 = scalar_lea.hbm %s1440_s2, %s696_s24  ;;  %s873_s22 = scalar_lea.hbm %s1440_s2, 3072 }
  0x40   : > { %s868_s14 = scalar_lea.hbm %s1221_s11, 1024  ;;  %p874_p4 = scmp.lt.u32.totalorder %s1221_s11, %s1440_s2 }
  0x41   : > { %p869_p7 = scmp.ne.s32.totalorder %s1221_s11, %s868_s14  ;;  %p875_p11 = scmp.lt.u32.totalorder %s873_s22, %s868_s14 }
  0x42   : > { %p877_p0 = scmp.lt.u32.totalorder %s868_s14, %s1221_s11 }
  0x43   : > { %p871_p9 = pnand %p1422_p8, %p869_p7  ;;  %p876_p13 = por %p875_p11, %p874_p4 }
  0x45   : > { %p872_p12 = pneg %p871_p9  ;;  %p878_p6 = por %p877_p0, %p876_p13 }
  0x47   : > { %p879_p5 = pnand %p878_p6, %p872_p12 }
  0x49   : > { %882 = shalt.err (!%p879_p5)
}
  0x4a   : > { %s883_s12 = scalar_lea.vmem %s1223_s27, 1024  ;;  %s1051_s30 = smov [#allocation8]  }
  0x4b   : > { %p884_p3 = scmp.ne.s32.totalorder %s1223_s27, %s883_s12  ;;  %s888_s15 = sshll.u32 %s1051_s30, 4  ;;  %s889_s15 = int_to_ptr.vmem [resolvable:$false] %s888_s15 }
  0x4c   : > { %s890_s23 = scalar_lea.vmem %s889_s15, 2048  ;;  %p891_p10 = scmp.lt.s32.totalorder %s1223_s27, %s889_s15 }
  0x4d   : > { %p886_p7 = pnand %p884_p3, %p1422_p8  ;;  %p892_p4 = scmp.lt.s32.totalorder %s890_s23, %s883_s12 }
  0x4f   : > { %p887_p9 = pneg %p886_p7  ;;  %p893_p11 = por %p892_p4, %p891_p10 }
  0x51   : > { %p894_p13 = pnand %p893_p11, %p887_p9 }
  0x53   : > { %897 = shalt.err (!%p894_p13)
}
  0x54   : > { %760 = dma.hbm_to_vmem [thread:$0]  (!%p1163_p2), %s1221_s11, 1024, %s1223_s27, %s1225_s8, %s1049_s29, %s1049_s29, %s1050_s9  }
  0x55   : > { %s1052_s14 = smov [#allocation6]   ;;  %s667_s24 = sshll.u32 %s1042_s19, 4 }
  0x56   : > { %s191_s22 = sshll.u32 %s1052_s14, 4  ;;  %s1260_s30 = scalar_lea.hbm %s1411_s3, %s667_s24  ;;  %s192_s22 = int_to_ptr.vmem [resolvable:$true] %s191_s22 }
  0x57   : > { %s898_s13 = scalar_lea.hbm %s1409_s1, 128  ;;  %p1441_p12 = pneg %p1157_p1 }
  0x58   : > { %p899_p10 = scmp.ne.s32.totalorder %s1409_s1, %s898_s13  ;;  %p905_p5 = scmp.lt.u32.totalorder %s898_s13, %s1409_s1 }
  0x5a   : > { %p901_p0 = pnand %p899_p10, %p1441_p12 }
  0x5c   : > { %p902_p6 = pneg %p901_p0 }
  0x5e   : > { %p907_p3 = pnand %p905_p5, %p902_p6 }
  0x60   : > { %910 = shalt.err (!%p907_p3)
}
  0x61   : > { %s911_s14 = scalar_lea.vmem %s192_s22, 128  ;;  %p1442_p9 = pmov %p1441_p12 }
  0x62   : > { %p912_p7 = scmp.ne.s32.totalorder %s192_s22, %s911_s14  ;;  %p919_p13 = scmp.lt.s32.totalorder %s192_s22, %s192_s22 }
  0x63   : > { %p920_p8 = scmp.lt.s32.totalorder %s911_s14, %s911_s14 }
  0x64   : > { %p914_p4 = pnand %p912_p7, %p1442_p9 }
  0x65   : > { %p921_p2 = por %p920_p8, %p919_p13 }
  0x66   : > { %p915_p11 = pneg %p914_p4 }
  0x68   : > { %p922_p10 = pnand %p921_p2, %p915_p11 }
  0x6a   : > { %925 = shalt.err (!%p922_p10)
}
  0x6b   : > { %756 = dma.hbm_to_vmem [thread:$0]  (!%p1157_p1), %s1409_s1, 128, %s192_s22, [#allocation7], %s1049_s29, %s1049_s29, %s1050_s9  }
  0x6c   : > { %s1443_s13 = sand.u32 1, %s1034_s17   ;;  %s926_s12 = scalar_lea.hbm %s1260_s30, 16 }
  0x6d   : > { %s229_s24 = scalar_lea.vmem [#allocation9], %s1443_s13  ;;  %p927_p2 = scmp.ne.s32.totalorder %s1260_s30, %s926_s12 }
  0x6e   : > { %s236_s10 = sshll.u32 %s229_s24, 4  ;;  %p1444_p8 = scmp.ne.s32.totalorder %s1436_s6, 0  ;;  %s237_s10 = int_to_ptr.vmem [resolvable:$true] %s236_s10 }
  0x6f   : > { %s931_s23 = scalar_lea.hbm %s1411_s3, 48  ;;  %p932_p5 = scmp.lt.u32.totalorder %s1260_s30, %s1411_s3 }
  0x70   : > { %p1445_p12 = pneg %p1444_p8  ;;  %p933_p3 = scmp.lt.u32.totalorder %s931_s23, %s926_s12 }
  0x71   : > { %p935_p7 = scmp.lt.u32.totalorder %s926_s12, %s1260_s30 }
  0x72   : > { %p929_p0 = pnand %p927_p2, %p1445_p12  ;;  %p934_p1 = por %p933_p3, %p932_p5 }
  0x74   : > { %p930_p6 = pneg %p929_p0  ;;  %p936_p9 = por %p935_p7, %p934_p1 }
  0x76   : > { %p937_p4 = pnand %p936_p9, %p930_p6 }
  0x78   : > { %940 = shalt.err (!%p937_p4)
}
  0x79   : > { %s941_s29 = scalar_lea.vmem %s237_s10, 16  ;;  %p1446_p13 = pmov %p1445_p12 }
  0x7a   : > { %p942_p11 = scmp.ne.s32.totalorder %s237_s10, %s941_s29  ;;  %s1053_s9 = smov [#allocation9]  }
  0x7b   : > { %s946_s22 = sshll.u32 %s1053_s9, 4  ;;  %s947_s22 = int_to_ptr.vmem [resolvable:$false] %s946_s22 }
  0x7c   : > { %p944_p10 = pnand %p942_p11, %p1446_p13  ;;  %s948_s14 = scalar_lea.vmem %s947_s22, 32 }
  0x7d   : > { %p949_p12 = scmp.lt.s32.totalorder %s237_s10, %s947_s22  ;;  %p950_p0 = scmp.lt.s32.totalorder %s948_s14, %s941_s29 }
  0x7e   : > { %p945_p2 = pneg %p944_p10 }
  0x7f   : > { %p951_p3 = por %p950_p0, %p949_p12 }
  0x81   : > { %p952_p5 = pnand %p951_p3, %p945_p2 }
  0x83   : > { %955 = shalt.err (!%p952_p5)
}
  0x84   : > { %763 = dma.hbm_to_vmem [thread:$0]  (!%p1444_p8), %s1260_s30, 16, %s237_s10, %s1225_s8  }
  0x85   : > { %p1447_p6 = scmp.ne.s32.totalorder %s1434_s28, 0 }
  0x86   : > { %p1448_p1 = scmp.eq.s32.totalorder (!%p1447_p6), %s1115_s21, 0 }
  0x87   : > { %245 = sbr.rel (%p1447_p6) target bundleno = 644 (0x284), region = 36 }
  0x8e   : > { %1009 = dma.done.wait (%p1448_p1), [#allocation4], 128   ;;  %p1449_p7 = pmov %p1448_p1 }
  0x8f   : > { %p1450_p9 = pmov %p1448_p1 }
  0x90   : > { %1011 = vsyncadd (%p1449_p7), [#allocation4], 4294967168 }
  0x91   : > { %1013 = dma.done.wait (%p1450_p9), [#allocation7], 128   ;;  %p1451_p4 = pmov %p1448_p1 }
  0x92   : > { %s255_s6 = sand.u32 1, %s1115_s21   ;;  %s1319_s8 = sand.u32 1, %s1030_s16  }
  0x93   : > { %1015 = vsyncadd (%p1451_p4), [#allocation7], 4294967168  ;;  %s671_s28 = sshll.u32 %s1319_s8, 6  ;;  %s256_s30 = scalar_lea.sflag [#allocation4], %s255_s6 }
  0x94   : > { %s1322_s0 = scalar_lea.vmem [#allocation8], %s671_s28  ;;  %p1452_p8 = scmp.ne.s32.totalorder %s1430_s25, 0 }
  0x96   : > { %1017 = dma.done.wait (%p1452_p8), %s256_s30, 1040  }
  0x97   : > { %1019 = vsyncadd (%p1452_p8), %s256_s30, 4294966256  ;;  %s672_s2 = sshll.u32 %s1319_s8, 4  ;;  %p299_p11 = scmp.eq.s32.totalorder %s1038_s18, 0 }
  0x98   : > { %s267_s13 = scalar_lea.vmem [#allocation9], %s1319_s8  ;;  %s1331_s24 = scalar_lea.vmem [#allocation10], %s672_s2  ;;  %v830_v0 = vld [vmem:[#allocation3] sm:$0xff] (%p299_p11)  }
  0x99   : > { %304 = sbr.rel (!%p299_p11) target bundleno = 160 (0xa0), region = 56  ;;  %313 = vst [vmem:[#allocation2] sm:$0xff] (%p299_p11), %v830_v0 }
  0xa0 PF: > { %p314_p13 = scmp.lt.s32.totalorder %s1038_s18, 0  ;;  %s315_s21 = ssub.s32 0, %s1038_s18  ;;  %v1054_v1 = vmov 0.0   ;;  %vm1055_vm0 = vmmov 0   ;;  %v832_v2 = vld [vmem:[%s1322_s0] sm:$0xff]   ;;  %v833_v3 = vld [vmem:[%s1322_s0 + $0x8] sm:$0xff]  }
  0xa1   : > { %710 = vmatprep.subr.bf16.mxu0 %v1054_v1  ;;  %s675_s25 = smin.u32 %s1038_s18, %s315_s21  ;;  %712 = vmatprep.mubr.msk.bf16.mxu0 %vm1055_vm0, %v1054_v1  ;;  %v831_v4 = vld [vmem:[#allocation6] sm:$0xff]   ;;  %v834_v6 = vld [vmem:[%s1322_s0 + $0x10] sm:$0xff]   ;;  %vm330_vm1 = vcmask 130048   ;;  %v836_v8 = vld [vmem:[%s1322_s0 + $0x20] sm:$0xff]  }
  0xa2   : > { %s317_s10 = sand.u32 1, %s675_s25   ;;  %716 = vmatprep.subr.bf16.mxu1 %v1054_v1  ;;  %732 = vmatprep.mubr.msk.bf16.mxu1 %vm1055_vm0, %v1054_v1  ;;  %v835_v7 = vld [vmem:[%s1322_s0 + $0x18] sm:$0xff]   ;;  %v837_v9 = vld [vmem:[%s1322_s0 + $0x28] sm:$0xff]   ;;  %v838_v10 = vld [vmem:[%s1322_s0 + $0x30] sm:$0xff]  }
  0xa3   : > { %s318_s12 = ssub.s32 0, %s317_s10  ;;  %717 = vmatpush3.bf16.msra.mxu1 %v832_v2  ;;  %v839_v11 = vld [vmem:[%s1322_s0 + $0x38] sm:$0xff]   ;;  %v679_v17 = vld [vmem:[%s267_s13] ss:$0 sm:$0xff] }
  0xa4   : > { %s1466_s12 = smov (!%p314_p13, %s318_s12), %s317_s10  ;;  %718 = vmatprep.subr.bf16.mxu1 %v1054_v1 }
  0xa5   : > { %s676_s5 = sshll.u32 %s1466_s12, 3  ;;  %p688_p10 = scmp.ne.s32.totalorder %s1466_s12, 0 }
  0xa6   : > { %s323_s15 = scalar_lea.vmem [#allocation2], %s676_s5 }
  0xa7   : > { %v324_v5 = vld [vmem:[%s323_s15] sm:$0xff]  ;;  %719 = vmatpush3.bf16.msra.mxu1 %v833_v3 }
  0xa8   : > { %711 = vmatpush3.bf16.msra.mxu0 %v324_v5  ;;  %720 = vmatprep.subr.bf16.mxu1 %v1054_v1 }
  0xab   : > { %713 = vmatmul.mubr.msk.bf16.vlgmr.msra.gmra.mrb[0].mxu0 %vm330_vm1, %v831_v4  ;;  %721 = vmatpush3.bf16.msra.mxu1 %v834_v6 }
  0xac   : > { %722 = vmatprep.subr.bf16.mxu1 %v1054_v1 }
  0xaf   : > { %723 = vmatpush3.bf16.msra.mxu1 %v835_v7 }
  0xb0   : > { %724 = vmatprep.subr.bf16.mxu1 %v1054_v1 }
  0xb3   : > { %725 = vmatpush3.bf16.msra.mxu1 %v836_v8 }
  0xb4   : > { %726 = vmatprep.subr.bf16.mxu1 %v1054_v1 }
  0xb7   : > { %727 = vmatpush3.bf16.msra.mxu1 %v837_v9 }
  0xb8   : > { %728 = vmatprep.subr.bf16.mxu1 %v1054_v1 }
  0xbb   : > { %729 = vmatpush3.bf16.msra.mxu1 %v838_v10 }
  0xbc   : > { %730 = vmatprep.subr.bf16.mxu1 %v1054_v1 }
  0xbf   : > { %731 = vmatpush3.bf16.msra.mxu1 %v839_v11 }
 0x17e   : > { %v368_v12 = vpop.f32.mrb[0].mxu0 }
 0x17f   : > { %v714_v13 = vpop.f32.mrb[1].mxu0 }
 0x180   : > { %v371_v14 = vpop.f32.mrb[2].mxu0 }
 0x181   : > { %v375_v15 = vpack.c.bf16 %v371_v14, %v368_v12  ;;  %v715_v16 = vpop.f32.mrb[3].mxu0 }
 0x183   : > { %733 = vmatmul.mubr.bf16.vlgmr.msra.gmra.mrb[0].mxu1 %v375_v15 }
 0x256   : > { %v481_v18 = vpop.f32.mrb[0].mxu1 }
 0x257   : > { %v482_v19 = vadd.f32 %v679_v17, %v481_v18  ;;  %v734_v20 = vpop.f32.mrb[1].mxu1  ;;  %497 = sbr.rel (%p688_p10) target bundleno = 608 (0x260), region = 60 }
 0x258   : > { %v484_v21 = vpop.f32.mrb[2].mxu1 }
 0x259   : > { %488 = vst [vmem:[%s1331_s24] sm:$0xff] %v482_v19  ;;  %v485_v22 = vadd.f32 %v679_v17, %v484_v21  ;;  %v735_v23 = vpop.f32.mrb[3].mxu1  ;;  %v490_v24 = vmax.f32 %v482_v19, 0.0 }
 0x25b   : > { %489 = vst [vmem:[%s1331_s24 + $0x8] sm:$0xff] %v485_v22  ;;  %v491_v25 = vmax.f32 %v485_v22, 0.0 }
 0x25d   : > { %v492_v26 = vpack.c.bf16 %v491_v25, %v490_v24 }
 0x25f   : > { %689 = vst [vmem:[#allocation2 + $0x8] sm:$0xff] %v492_v26 }
 0x260 PF: > { %p690_p2 = scmp.ne.s32.totalorder %s1466_s12, 1 }
 0x261   : > { %512 = vst [vmem:[#allocation2] sm:$0xff] (!%p690_p2), %v492_v26 }
 0x262   : > { %507 = sbr.rel (%p690_p2) target bundleno = 617 (0x269), region = 64 }
 0x269 PF: > { %s698_s23 = sshll.u32 %s1038_s18, 8  ;;  %s1453_s29 = sld [smem:[#allocation19_spill]] }
 0x26a   : > { %s529_s22 = sshll.u32 %s1331_s24, 4  ;;  %s514_s14 = scalar_lea.sflag [#allocation5], %s1319_s8  ;;  %s1360_s22 = int_to_ptr.vmem [resolvable:$true] %s529_s22 }
 0x26b   : > { %s956_s6 = scalar_lea.vmem %s1360_s22, 256  ;;  %p1454_p0 = scmp.ne.s32.totalorder %s1431_s26, 0 }
 0x26c   : > { %p957_p12 = scmp.ne.s32.totalorder %s1360_s22, %s956_s6  ;;  %s1056_s28 = smov [#allocation10]  }
 0x26d   : > { %s960_s30 = sshll.u32 %s1056_s28, 4  ;;  %s961_s30 = int_to_ptr.vmem [resolvable:$false] %s960_s30 }
 0x26e   : > { %p958_p3 = pnand %p957_p12, %p1454_p0  ;;  %s962_s18 = scalar_lea.vmem %s961_s30, 512 }
 0x26f   : > { %s1357_s9 = scalar_lea.hbm %s1453_s29, %s698_s23  ;;  %p963_p6 = scmp.lt.s32.totalorder %s1360_s22, %s961_s30 }
 0x270   : > { %p959_p5 = pneg %p958_p3  ;;  %p964_p1 = scmp.lt.s32.totalorder %s962_s18, %s956_s6 }
 0x272   : > { %p965_p7 = por %p964_p1, %p963_p6 }
 0x274   : > { %p966_p9 = pnand %p965_p7, %p959_p5 }
 0x276   : > { %969 = shalt.err (!%p966_p9)
}
 0x277   : > { %s970_s0 = scalar_lea.hbm %s1357_s9, 256  ;;  %s974_s24 = scalar_lea.hbm %s1453_s29, 768 }
 0x278   : > { %p971_p4 = scmp.ne.s32.totalorder %s1357_s9, %s970_s0  ;;  %p975_p13 = scmp.lt.u32.totalorder %s1357_s9, %s1453_s29 }
 0x279   : > { %p976_p10 = scmp.lt.u32.totalorder %s974_s24, %s970_s0  ;;  %p978_p12 = scmp.lt.u32.totalorder %s970_s0, %s1357_s9 }
 0x27a   : > { %p972_p8 = pnand %p971_p4, %p1454_p0 }
 0x27b   : > { %p977_p2 = por %p976_p10, %p975_p13 }
 0x27c   : > { %p973_p11 = pneg %p972_p8 }
 0x27d   : > { %p979_p3 = por %p978_p12, %p977_p2 }
 0x27f   : > { %p980_p5 = pnand %p979_p3, %p973_p11 }
 0x281   : > { %983 = shalt.err (!%p980_p5)
}
 0x282   : > { %s1057_s10 = smov 128   ;;  %s1058_s12 = smov 8  }
 0x283   : > { %748 = dma.vmem_to_hbm [thread:$0]  (%p1454_p0), %s1360_s22, 256, %s1357_s9, %s514_s14, %s1057_s10, %s1057_s10, %s1058_s12  }
 0x284 PF: > { %s1455_s5 = sld [smem:[#allocation15_spill]]  ;;  %s1456_s15 = sld [smem:[#allocation16_spill]] }
 0x285   : > { %p773_p6 = scmp.ge.s32.totalorder %s1046_s20, 2 }
 0x28a   : > { %s544_s23 = sand.u32 1, %s1455_s5   ;;  %p1457_p1 = scmp.ne.s32.totalorder %s1456_s15, 0 }
 0x28b   : > { %s545_s27 = scalar_lea.sflag [#allocation5], %s544_s23 }
 0x28c   : > { %p765_p7 = pnand %p773_p6, %p1457_p1 }
 0x28e   : > { %1021 = dma.done.wait (!%p765_p7), %s545_s27, 256  }
 0x28f   : > { %1023 = vsyncadd (!%p765_p7), %s545_s27, 4294967040  ;;  %s19_s20 = sadd.s32 1, %s1046_s20   ;;  %s1458_s15 = smov %s1030_s16 }
 0x290   : > { %p16_p9 = scmp.ge.s32.totalorder %s19_s20, 5   ;;  %s1459_s16 = smov %s1034_s17 }
 0x291   : > { %s1460_s17 = smov %s1216_s4  ;;  %s1461_s18 = smov %s1042_s19 }
 0x292   : > { %s1462_s19 = smov %s1464_s7  ;;  %18 = sbr.rel (!%p16_p9) target bundleno = 10 (0xa), region = 115 }
 0x299   :  { %550 = vsyncpa [#allocation4], 1 }
 0x29a   :  { %552 = vsyncpa [#allocation4 + $0x1], 1 }
 0x29b   :  { %553 = vsyncpa [#allocation7], 1 }
 0x29c   :  { %554 = vsyncpa [#allocation5], 1 }
 0x29d   :  { %556 = vsyncpa [#allocation5 + $0x1], 1 }

</bundles_post_ra>
